<compile_context>
chip_gen: v5e
topology: v5e:2x2
jax: 0.10.0
libtpu: 0.0.40
codegen_flags: <defaults>
</compile_context>

<pallas_src>
import functools

import jax
import jax.numpy as jnp
from jax.experimental import pallas as pl
from jax.experimental.pallas import tpu as pltpu

LANE = 128


def _round_up(x, m):
    return (x + m - 1) // m * m


def _detect_vmem_limit():
    """Generation-aware scoped-VMEM cap: ~3/4 of physical, capped at ~96 MiB."""
    try:
        cap = int(pltpu.get_tpu_info().vmem_capacity_bytes)
        return max(min(cap * 3 // 4, 96 * 1024 * 1024), 16 * 1024 * 1024)
    except Exception:
        return 48 * 1024 * 1024  # safe on v5e/v6e/v7x


VMEM_LIMIT = _detect_vmem_limit()
# Per-layer bf16 weight size below which the weight is kept VMEM-resident.
RESIDENT_W_BYTES = min(8 * 1024 * 1024, VMEM_LIMIT // 4)


# ----------------------------------------------------------------------------- kernels

def matmul_affine_resident_kernel(x_ref, w_ref, shift_ref, *rest,
                                  relu, has_residual):
    """o = [relu]((x @ w) + shift [+ residual]); full-K weight resident in VMEM."""
    if has_residual:
        res_ref, o_ref = rest
    else:
        (o_ref,) = rest
    y = jnp.dot(x_ref[...], w_ref[...], preferred_element_type=jnp.float32)
    y = y + shift_ref[...]
    if has_residual:
        y = y + res_ref[...].astype(jnp.float32)
    if relu:
        y = jnp.maximum(y, 0.0)
    o_ref[...] = y.astype(o_ref.dtype)


def matmul_affine_tiled_kernel(x_ref, w_ref, shift_ref, *rest,
                               relu, has_residual):
    """K-streamed fallback: f32 VMEM accumulator, epilogue on last k step."""
    if has_residual:
        res_ref, o_ref, acc_ref = rest
    else:
        o_ref, acc_ref = rest

    @pl.when(pl.program_id(2) == 0)
    def _init():
        acc_ref[...] = jnp.zeros_like(acc_ref)

    acc_ref[...] += jnp.dot(x_ref[...], w_ref[...],
                            preferred_element_type=jnp.float32)

    @pl.when(pl.program_id(2) == pl.num_programs(2) - 1)
    def _epilogue():
        y = acc_ref[...] + shift_ref[...]
        if has_residual:
            y = y + res_ref[...].astype(jnp.float32)
        if relu:
            y = jnp.maximum(y, 0.0)
        o_ref[...] = y.astype(o_ref.dtype)


def max_reduce_kernel(p_ref, o_ref):
    # p: (3, tm, C) row taps (columns already pre-maxed) -> max over taps
    o_ref[...] = jnp.max(p_ref[...], axis=0)


def avgpool_embed_kernel(x_ref, w_ref, b_ref, o_ref, *, inv_hw):
    # fused adaptive-avg-pool + Linear: mean over HW (f32), then bf16 dot + bias
    feats = jnp.sum(x_ref[...].astype(jnp.float32), axis=1) * inv_hw  # (bn, C)
    o_ref[...] = jnp.dot(feats.astype(w_ref.dtype), w_ref[...],
                         preferred_element_type=jnp.float32) + b_ref[...]


# ----------------------------------------------------------------------------- pallas wrappers

def _matmul_affine_resident(x, w, shift, relu, residual, out_dtype, tm):
    M, K = x.shape
    Cout = w.shape[1]
    Mp = _round_up(M, tm)
    if Mp != M:
        x = jnp.pad(x, ((0, Mp - M), (0, 0)))
        if residual is not None:
            residual = jnp.pad(residual, ((0, Mp - M), (0, 0)))

    in_specs = [
        pl.BlockSpec((tm, K), lambda i: (i, 0)),          # streamed row panel
        pl.BlockSpec((K, Cout), lambda i: (0, 0)),        # VMEM-resident weight
        pl.BlockSpec((1, Cout), lambda i: (0, 0)),
    ]
    args = [x, w, shift]
    if residual is not None:
        in_specs.append(pl.BlockSpec((tm, Cout), lambda i: (i, 0)))
        args.append(residual)

    kernel = functools.partial(matmul_affine_resident_kernel, relu=relu,
                               has_residual=residual is not None)
    return pl.pallas_call(
        kernel,
        out_shape=jax.ShapeDtypeStruct((Mp, Cout), out_dtype),
        grid_spec=pltpu.PrefetchScalarGridSpec(
            num_scalar_prefetch=0,
            grid=(Mp // tm,),
            in_specs=in_specs,
            out_specs=pl.BlockSpec((tm, Cout), lambda i: (i, 0)),
        ),
        compiler_params=pltpu.CompilerParams(
            dimension_semantics=("parallel",),   # shards over v7x's 2 TCs
            vmem_limit_bytes=VMEM_LIMIT,
        ),
    )(*args)


def _matmul_affine_tiled(x, w, shift, relu, residual, out_dtype):
    M, K = x.shape
    Cout = w.shape[1]

    tm = 512 if M >= 512 else _round_up(M, 16)
    Mp = _round_up(M, tm)
    if Mp != M:
        x = jnp.pad(x, ((0, Mp - M), (0, 0)))
        if residual is not None:
            residual = jnp.pad(residual, ((0, Mp - M), (0, 0)))

    # tn=256 matches the 256-wide MXU on v6e/v7x (real ResNet widths are %256)
    tn = 256 if Cout % 256 == 0 else LANE
    if K <= 2048:
        tk = K
    elif K % 512 == 0:
        tk = 512
    elif K % 256 == 0:
        tk = 256
    else:
        tk = LANE

    grid = (Mp // tm, Cout // tn, K // tk)
    in_specs = [
        pl.BlockSpec((tm, tk), lambda i, j, k: (i, k)),
        pl.BlockSpec((tk, tn), lambda i, j, k: (k, j)),
        pl.BlockSpec((1, tn), lambda i, j, k: (0, j)),
    ]
    args = [x, w, shift]
    if residual is not None:
        in_specs.append(pl.BlockSpec((tm, tn), lambda i, j, k: (i, j)))
        args.append(residual)

    kernel = functools.partial(matmul_affine_tiled_kernel, relu=relu,
                               has_residual=residual is not None)
    return pl.pallas_call(
        kernel,
        out_shape=jax.ShapeDtypeStruct((Mp, Cout), out_dtype),
        grid_spec=pltpu.PrefetchScalarGridSpec(
            num_scalar_prefetch=0,
            grid=grid,
            in_specs=in_specs,
            out_specs=pl.BlockSpec((tm, tn), lambda i, j, k: (i, j)),
            scratch_shapes=[pltpu.VMEM((tm, tn), jnp.float32)],
        ),
        compiler_params=pltpu.CompilerParams(
            dimension_semantics=("parallel", "parallel", "arbitrary"),
            vmem_limit_bytes=VMEM_LIMIT,
        ),
    )(*args)


def matmul_affine(x_bf16, w_bf16, shift, relu, residual=None,
                  out_dtype=jnp.bfloat16, force_tiled=False):
    """(M,K)bf16 @ (K,Cout)bf16 + shift [+res] [relu] -> (Mp,Cout) out_dtype.

    K and Cout must be multiples of 128 (callers guarantee via padding).
    Output rows beyond M are padding; callers slice them off.
    """
    M, K = x_bf16.shape
    Kw, Cout = w_bf16.shape
    assert Kw == K and Cout % LANE == 0 and K % LANE == 0

    out_size = jnp.dtype(out_dtype).itemsize
    mp16 = _round_up(M, 16)

    if not force_tiled and K * Cout * 2 <= RESIDENT_W_BYTES:
        # pick the largest M-panel that keeps everything (double-buffered)
        # comfortably inside the scoped VMEM budget.
        cands = ([mp16] if mp16 < 512 else []) + \
                [c for c in (512, 256, 128, 64, 32, 16) if c <= mp16]
        seen = set()
        cands = [c for c in cands if not (c in seen or seen.add(c))]
        wb = 2 * K * Cout * 2
        for tm in cands:
            xb = 2 * tm * K * 2
            ob = 2 * tm * Cout * out_size
            rb = 2 * tm * Cout * 2 if residual is not None else 0
            if xb + wb + ob + rb + 2 * Cout * 4 <= int(VMEM_LIMIT * 0.8):
                return _matmul_affine_resident(x_bf16, w_bf16, shift, relu,
                                               residual, out_dtype, tm)
    return _matmul_affine_tiled(x_bf16, w_bf16, shift, relu, residual,
                                out_dtype)


# ----------------------------------------------------------------------------- conv / pool glue

def _im2col(x, kh, kw, stride, pad):
    # x: (N, H, W, C) -> patches (N*Ho*Wo, kh*kw*C), layout (kh, kw, C) along K
    N, H, W, C = x.shape
    xp = jnp.pad(x, ((0, 0), (pad, pad), (pad, pad), (0, 0)))
    Ho = (H + 2 * pad - kh) // stride + 1
    Wo = (W + 2 * pad - kw) // stride + 1
    cols = []
    for i in range(kh):
        for j in range(kw):
            cols.append(xp[:, i:i + stride * Ho:stride, j:j + stride * Wo:stride, :])
    patches = jnp.stack(cols, axis=3)                 # (N, Ho, Wo, kh*kw, C)
    return patches.reshape(N * Ho * Wo, kh * kw * C), N, Ho, Wo


def conv_bn(x_nhwc, wp, kh, kw, stride, pad, relu, residual=None):
    """wp = dict(w2d=(Kp, Cout_pad) bf16 with BN scale folded, shift=(1, Cout_pad))."""
    w2d, shift = wp["w2d"], wp["shift"]
    # cast BEFORE patch extraction so the materialized im2col buffer is bf16
    patches, N, Ho, Wo = _im2col(x_nhwc.astype(jnp.bfloat16), kh, kw, stride, pad)
    M, K = patches.shape
    Kp = w2d.shape[0]
    if Kp != K:                                       # e.g. conv1: 147 -> 256
        patches = jnp.pad(patches, ((0, 0), (0, Kp - K)))
    cout_pad = w2d.shape[1]
    res2d = None
    if residual is not None:
        # NOTE: residual rides in bf16 (inference-grade); keep f32 if bit-exact
        # parity with the PyTorch reference is required.
        res2d = residual.reshape(-1, cout_pad).astype(jnp.bfloat16)
    out = matmul_affine(patches, w2d, shift, relu, residual=res2d)
    return out[:M].reshape(N, Ho, Wo, cout_pad)


def max_pool_3x3_s2_p1(x_nhwc):
    N, H, W, C = x_nhwc.shape
    k, stride, pad = 3, 2, 1
    x_bf = x_nhwc.astype(jnp.bfloat16)
    xp = jnp.pad(x_bf, ((0, 0), (pad, pad), (pad, pad), (0, 0)),
                 constant_values=-jnp.inf)
    Ho = (H + 2 * pad - k) // stride + 1
    Wo = (W + 2 * pad - k) // stride + 1

    # separable pool: pre-max the 3 column taps in XLA glue (3x less traffic)
    cols = [xp[:, :, j:j + stride * Wo:stride, :] for j in range(k)]
    hmax = jnp.maximum(jnp.maximum(cols[0], cols[1]), cols[2])   # (N, Hp, Wo, C)

    M = N * Ho * Wo
    slabs = [hmax[:, i:i + stride * Ho:stride, :, :].reshape(M, C)
             for i in range(k)]
    patches = jnp.stack(slabs, axis=0)                # (3, M, C) bf16

    tm = min(1024, _round_up(M, 16))
    Mp = _round_up(M, tm)
    if Mp != M:
        patches = jnp.pad(patches, ((0, 0), (0, Mp - M), (0, 0)))

    out = pl.pallas_call(
        max_reduce_kernel,
        out_shape=jax.ShapeDtypeStruct((Mp, C), jnp.bfloat16),
        grid_spec=pltpu.PrefetchScalarGridSpec(
            num_scalar_prefetch=0,
            grid=(Mp // tm,),
            in_specs=[pl.BlockSpec((k, tm, C), lambda i: (0, i, 0))],
            out_specs=pl.BlockSpec((tm, C), lambda i: (i, 0)),
        ),
        compiler_params=pltpu.CompilerParams(
            dimension_semantics=("parallel",),
            vmem_limit_bytes=VMEM_LIMIT,
        ),
    )(patches)
    return out[:M].reshape(N, Ho, Wo, C)


def avgpool_embed(x_nhwc, ep, embed_size):
    """Fused global-average-pool + Linear(embed), batch-tiled."""
    N, H, W, C = x_nhwc.shape
    w, b = ep["w"], ep["b"]                           # (C, Epad) bf16, (1, Epad) f32
    e_pad = w.shape[1]
    bn = 8                                            # rows of N per block
    Np = _round_up(N, bn)
    xr = x_nhwc.astype(jnp.bfloat16).reshape(N, H * W, C)
    if Np != N:
        xr = jnp.pad(xr, ((0, Np - N), (0, 0), (0, 0)))
    out = pl.pallas_call(
        functools.partial(avgpool_embed_kernel, inv_hw=1.0 / float(H * W)),
        out_shape=jax.ShapeDtypeStruct((Np, e_pad), jnp.float32),
        grid_spec=pltpu.PrefetchScalarGridSpec(
            num_scalar_prefetch=0,
            grid=(Np // bn,),
            in_specs=[
                pl.BlockSpec((bn, H * W, C), lambda i: (i, 0, 0)),
                pl.BlockSpec((C, e_pad), lambda i: (0, 0)),
                pl.BlockSpec((1, e_pad), lambda i: (0, 0)),
            ],
            out_specs=pl.BlockSpec((bn, e_pad), lambda i: (i, 0)),
        ),
        compiler_params=pltpu.CompilerParams(
            dimension_semantics=("parallel",),
            vmem_limit_bytes=VMEM_LIMIT,
        ),
    )(xr, w, b)
    return out[:N, :embed_size]


# ----------------------------------------------------------------------------- parameters

def _bn_fold(gamma, beta, mean, var, eps=1e-5):
    scale = gamma / jnp.sqrt(var + eps)
    shift = beta - mean * scale
    return scale, shift


def _make_bn(key, c):
    k1, k2, k3, k4 = jax.random.split(key, 4)
    gamma = 1.0 + 0.1 * jax.random.normal(k1, (c,), jnp.float32)
    beta = 0.1 * jax.random.normal(k2, (c,), jnp.float32)
    mean = 0.1 * jax.random.normal(k3, (c,), jnp.float32)
    var = 1.0 + 0.1 * jnp.abs(jax.random.normal(k4, (c,), jnp.float32))
    return _bn_fold(gamma, beta, mean, var)


def init_params(key, embed_size):
    # scaled-down resnet50-style widths
    c1, cb_in, cb_mid, cb_out = 8, 8, 4, 16
    keys = jax.random.split(key, 12)
    p = {}
    p["conv1_w"] = 0.1 * jax.random.normal(keys[0], (c1, 3, 7, 7), jnp.float32)
    p["bn1"] = _make_bn(keys[1], c1)
    # bottleneck block (layer1[0])
    p["wa"] = 0.1 * jax.random.normal(keys[2], (cb_mid, cb_in, 1, 1), jnp.float32)
    p["bna"] = _make_bn(keys[3], cb_mid)
    p["wb"] = 0.1 * jax.random.normal(keys[4], (cb_mid, cb_mid, 3, 3), jnp.float32)
    p["bnb"] = _make_bn(keys[5], cb_mid)
    p["wc"] = 0.1 * jax.random.normal(keys[6], (cb_out, cb_mid, 1, 1), jnp.float32)
    p["bnc"] = _make_bn(keys[7], cb_out)
    p["wds"] = 0.1 * jax.random.normal(keys[8], (cb_out, cb_in, 1, 1), jnp.float32)
    p["bnds"] = _make_bn(keys[9], cb_out)
    # embed: Linear(cb_out -> embed_size), PyTorch weight layout (out, in)
    p["embed_w"] = 0.1 * jax.random.normal(keys[10], (embed_size, cb_out), jnp.float32)
    p["embed_b"] = 0.1 * jax.random.normal(keys[11], (embed_size,), jnp.float32)
    return p


def _prep_conv(w_oihw, bn, cin_eff):
    """One-time weight prep: fold BN scale into weights, OIHW -> (Kp, Cout_pad) bf16.

    cin_eff = channel count of the incoming (possibly lane-padded) activation.
    Extra in-channels / out-channels are zero-padded so padded lanes stay 0.
    """
    cout, cin, kh, kw = w_oihw.shape
    scale, shift = bn
    cout_pad = _round_up(cout, LANE)
    w = w_oihw * scale[:, None, None, None]                    # fold BN scale (f32)
    w = jnp.transpose(w, (2, 3, 1, 0))                         # (kh, kw, Cin, Cout)
    w = jnp.pad(w, ((0, 0), (0, 0), (0, cin_eff - cin), (0, cout_pad - cout)))
    w2d = w.reshape(kh * kw * cin_eff, cout_pad)
    kp = _round_up(w2d.shape[0], LANE)
    if kp != w2d.shape[0]:
        w2d = jnp.pad(w2d, ((0, kp - w2d.shape[0]), (0, 0)))
    shift_p = jnp.pad(shift, (0, cout_pad - cout)).reshape(1, -1).astype(jnp.float32)
    return dict(w2d=w2d.astype(jnp.bfloat16), shift=shift_p)


def _prep_embed(w_oi, b, cin_eff):
    e, c = w_oi.shape
    e_pad = _round_up(e, LANE)
    w = jnp.transpose(w_oi)                                    # (C, E)
    w = jnp.pad(w, ((0, cin_eff - c), (0, e_pad - e)))
    b_p = jnp.pad(b, (0, e_pad - e)).reshape(1, -1).astype(jnp.float32)
    return dict(w=w.astype(jnp.bfloat16), b=b_p)


def prepare_params(p):
    """Hoist all reshapes / transposes / BN folds / lane padding out of forward."""
    c1_pad = _round_up(p["conv1_w"].shape[0], LANE)            # 128
    cb_out_pad = _round_up(p["wc"].shape[0], LANE)             # 128
    pp = {}
    pp["conv1"] = _prep_conv(p["conv1_w"], p["bn1"], cin_eff=3)   # raw RGB input
    pp["wa"] = _prep_conv(p["wa"], p["bna"], cin_eff=c1_pad)
    cb_mid_pad = _round_up(p["wa"].shape[0], LANE)
    pp["wb"] = _prep_conv(p["wb"], p["bnb"], cin_eff=cb_mid_pad)
    pp["wc"] = _prep_conv(p["wc"], p["bnc"], cin_eff=cb_mid_pad)
    pp["wds"] = _prep_conv(p["wds"], p["bnds"], cin_eff=c1_pad)
    pp["embed"] = _prep_embed(p["embed_w"], p["embed_b"], cin_eff=cb_out_pad)
    return pp


# ----------------------------------------------------------------------------- forward

def encoder_cnn_forward(images_nchw, pp, embed_size):
    # images: (N, 3, H, W) float32, PyTorch NCHW convention
    x = jnp.transpose(images_nchw, (0, 2, 3, 1)).astype(jnp.float32)   # -> NHWC

    # conv1 7x7/2 + bn + relu (output lane-padded to 128 channels, bf16)
    x = conv_bn(x, pp["conv1"], kh=7, kw=7, stride=2, pad=3, relu=True)
    # maxpool 3x3/2 pad 1
    x = max_pool_3x3_s2_p1(x)

    # bottleneck block; residual add + ReLU fused into the wc conv epilogue
    identity = x
    y = conv_bn(x, pp["wa"], kh=1, kw=1, stride=1, pad=0, relu=True)
    y = conv_bn(y, pp["wb"], kh=3, kw=3, stride=1, pad=1, relu=True)
    ds = conv_bn(identity, pp["wds"], kh=1, kw=1, stride=1, pad=0, relu=False)
    x = conv_bn(y, pp["wc"], kh=1, kw=1, stride=1, pad=0, relu=True, residual=ds)

    # fused adaptive avg pool + self.embed (features @ W.T + b)
    return avgpool_embed(x, pp["embed"], embed_size)           # (N, embed_size)


# ----------------------------------------------------------------------------- main

if __name__ == "__main__":
    key = jax.random.PRNGKey(0)
    k_img, k_par, k_x, k_w = jax.random.split(key, 4)
    embed_size = 32
    images = jax.random.normal(k_img, (2, 3, 16, 16), dtype=jnp.float32)  # NCHW
    raw_params = init_params(k_par, embed_size)
    params = prepare_params(raw_params)          # one-time prep, off the hot path

    feats = encoder_cnn_forward(images, params, embed_size)
    feats = jax.block_until_ready(feats)

    assert feats.shape == (2, embed_size), feats.shape
    assert feats.dtype == jnp.float32
    assert bool(jnp.all(jnp.isfinite(feats)))

    # coverage check: resident-weight path and tiled fallback agree
    xs = jax.random.normal(k_x, (64, 256), jnp.float32).astype(jnp.bfloat16)
    ws = (0.05 * jax.random.normal(k_w, (256, 128), jnp.float32)).astype(jnp.bfloat16)
    sh = jnp.zeros((1, 128), jnp.float32)
    y_res = matmul_affine(xs, ws, sh, relu=True)[:64]
    y_til = matmul_affine(xs, ws, sh, relu=True, force_tiled=True)[:64]
    jax.block_until_ready((y_res, y_til))
    assert bool(jnp.allclose(y_res.astype(jnp.float32), y_til.astype(jnp.float32),
                             atol=1e-2, rtol=1e-2))

    print("KERNEL_OK")
</pallas_src>

<mosaic_0001>
module attributes {stable_mosaic.version = 11 : i64} {
  func.func @matmul_affine_resident_kernel(%arg0: i32, %arg1: memref<128x256xbf16, #tpu.memory_space<vmem>>, %arg2: memref<256x128xbf16, #tpu.memory_space<vmem>>, %arg3: memref<1x128xf32, #tpu.memory_space<vmem>>, %arg4: memref<128x128xbf16, #tpu.memory_space<vmem>>) attributes {dimension_semantics = [#tpu.dimension_semantics<parallel>], iteration_bounds = array<i64: 1>, scalar_prefetch = 0 : i64, scratch_operands = 0 : i64, tpu.core_type = #tpu.core_type<tc>, window_params = [{transform_indices = @transform_0, window_bounds = array<i64: 128, 256>}, {pipeline_mode = #tpu.pipeline_mode<synchronous>, transform_indices = @transform_1, window_bounds = array<i64: 256, 128>}, {pipeline_mode = #tpu.pipeline_mode<synchronous>, transform_indices = @transform_2, window_bounds = array<i64: 1, 128>}, {transform_indices = @transform_3, window_bounds = array<i64: 128, 128>}]} {
    %c0 = arith.constant 0 : index
    %c0_0 = arith.constant 0 : index
    %0 = vector.load %arg1[%c0, %c0_0] : memref<128x256xbf16, #tpu.memory_space<vmem>>, vector<128x256xbf16>
    %c0_1 = arith.constant 0 : index
    %c0_2 = arith.constant 0 : index
    %1 = vector.load %arg2[%c0_1, %c0_2] : memref<256x128xbf16, #tpu.memory_space<vmem>>, vector<256x128xbf16>
    %cst = arith.constant dense<0.000000e+00> : vector<128x128xf32>
    %2 = tpu.matmul %0, %1, %cst {dimension_numbers = #tpu.dot_dimension_numbers<[1], [0], [0], [1], [0, 0, 1, 1], [], []>} : vector<128x256xbf16>, vector<256x128xbf16>, vector<128x128xf32> -> vector<128x128xf32>
    %c0_3 = arith.constant 0 : index
    %c0_4 = arith.constant 0 : index
    %3 = vector.load %arg3[%c0_3, %c0_4] : memref<1x128xf32, #tpu.memory_space<vmem>>, vector<1x128xf32>
    %4 = vector.broadcast %3 : vector<1x128xf32> to vector<128x128xf32>
    %5 = arith.addf %2, %4 : vector<128x128xf32>
    %cst_5 = arith.constant 0.000000e+00 : f32
    %6 = vector.broadcast %cst_5 : f32 to vector<128x128xf32>
    %7 = arith.maximumf %5, %6 : vector<128x128xf32>
    %8 = arith.truncf %7 : vector<128x128xf32> to vector<128x128xbf16>
    %c0_6 = arith.constant 0 : index
    %c0_7 = arith.constant 0 : index
    %9 = vector.load %arg4[%c0_6, %c0_7] : memref<128x128xbf16, #tpu.memory_space<vmem>>, vector<128x128xbf16>
    tpu.vector_store %arg4[%c0_6, %c0_7], %8 {strides = array<i32>} : memref<128x128xbf16, #tpu.memory_space<vmem>>, vector<128x128xbf16>,
    return
  }
  func.func @transform_0(%arg0: i32) -> (i32, i32) {
    %c0_i32 = arith.constant 0 : i32
    %c0_i32_0 = arith.constant 0 : i32
    return %arg0, %c0_i32 : i32, i32
  }
  func.func @transform_1(%arg0: i32) -> (i32, i32) {
    %c0_i32 = arith.constant 0 : i32
    %c0_i32_0 = arith.constant 0 : i32
    %c0_i32_1 = arith.constant 0 : i32
    return %c0_i32, %c0_i32_0 : i32, i32
  }
  func.func @transform_2(%arg0: i32) -> (i32, i32) {
    %c0_i32 = arith.constant 0 : i32
    %c0_i32_0 = arith.constant 0 : i32
    %c0_i32_1 = arith.constant 0 : i32
    return %c0_i32, %c0_i32_0 : i32, i32
  }
  func.func @transform_3(%arg0: i32) -> (i32, i32) {
    %c0_i32 = arith.constant 0 : i32
    %c0_i32_0 = arith.constant 0 : i32
    return %arg0, %c0_i32 : i32, i32
  }
}

</mosaic_0001>

<bundles_post_ra>
// kernel: tpu_custom_call.1
= control target key start
LH: loop header
LB: loop body
LE: loop exit
PB: predicated region body
PF: predicated region fallthrough
CT: control target
= control target key end

     0   :  { %8 = vsyncpa [#allocation3], 0  ;;  %s813_s0 = inlined_call_operand.hbm [shape: bf16[128,256], index: 0, kind: input, shape index: {}]   ;;  %s814_s1 = inlined_call_operand.hbm [shape: bf16[256,128], index: 1, kind: input, shape index: {}]   ;;  %s815_s2 = inlined_call_operand.vmem [shape: f32[1,128], index: 2, kind: input, shape index: {}]   ;;  %s816_s3 = inlined_call_operand.hbm [shape: bf16[128,128], index: 3, kind: output, shape index: {}]  }
   0x1   :  { %9 = vsyncpa [#allocation6], 0 }
   0x2   :  { %10 = vsyncpa [#allocation4], 0  ;;  %s15_s14 = sshll.u32 %s813_s0, 4  ;;  %s750_s15 = smov [#allocation2]   ;;  %s16_s14 = int_to_ptr.hbm [resolvable:$true] %s15_s14 }
   0x3   :  { %s17_s16 = sshll.u32 %s750_s15, 4  ;;  %s28_s19 = sshll.u32 %s814_s1, 4  ;;  %s18_s16 = int_to_ptr.vmem [resolvable:$true] %s17_s16  ;;  %s29_s19 = int_to_ptr.hbm [resolvable:$true] %s28_s19 }
   0x4   :  { %s751_s20 = smov 128   ;;  %s752_s21 = smov 8  }
   0x5   :  { %23 = dma.hbm_to_vmem [thread:$0]  %s16_s14, 2048, %s18_s16, [#allocation3], %s751_s20, %s751_s20, %s752_s21  }
   0x6   :  { %s753_s22 = smov [#allocation5]   ;;  %s754_s24 = smov 64  }
   0x7   :  { %s30_s23 = sshll.u32 %s753_s22, 4  ;;  %s755_s25 = smov 4   ;;  %s31_s23 = int_to_ptr.vmem [resolvable:$true] %s30_s23 }
   0x8   :  { %36 = dma.hbm_to_vmem [thread:$0]  %s29_s19, 2048, %s31_s23, [#allocation6], %s754_s24, %s754_s24, %s755_s25  }
   0x9   :  { %744 = dma.done.wait [#allocation3], 2048  }
   0xa   :  { %745 = vsyncadd [#allocation3], 4294965248 }
   0xb   :  { %746 = dma.done.wait [#allocation6], 2048  }
   0xc   :  { %747 = vsyncadd [#allocation6], 4294965248  ;;  %v592_v0 = vld [vmem:[#allocation5 + $0x38] sm:$0xff]  ;;  %v591_v2 = vld [vmem:[#allocation5 + $0x30] sm:$0xff]  ;;  %s427_s29 = sshll.u32 %s816_s3, 4  ;;  %s428_s29 = int_to_ptr.hbm [resolvable:$true] %s427_s29 }
   0xd   :  { %v600_v1 = vld [vmem:[#allocation5 + $0x78] sm:$0xff]  ;;  %275 = vmatpush.bf16.msra.mxu0 %v592_v0  ;;  %648 = vmatpush.bf16.msra.mxu2 %v592_v0  ;;  %v599_v3 = vld [vmem:[#allocation5 + $0x70] sm:$0xff]  ;;  %v590_v4 = vld [vmem:[#allocation5 + $0x28] sm:$0xff] }
   0xe   :  { %324 = vmatpush.bf16.msra.mxu1 %v600_v1  ;;  %656 = vmatpush.bf16.msra.mxu3 %v600_v1  ;;  %v598_v5 = vld [vmem:[#allocation5 + $0x68] sm:$0xff]  ;;  %v589_v6 = vld [vmem:[#allocation5 + $0x20] sm:$0xff]  ;;  %v588_v8 = vld [vmem:[#allocation5 + $0x18] sm:$0xff] }
   0xf   :  { %v597_v7 = vld [vmem:[#allocation5 + $0x60] sm:$0xff]  ;;  %v596_v9 = vld [vmem:[#allocation5 + $0x58] sm:$0xff]  ;;  %v587_v10 = vld [vmem:[#allocation5 + $0x10] sm:$0xff] }
  0x10   :  { %v595_v11 = vld [vmem:[#allocation5 + $0x50] sm:$0xff]  ;;  %v586_v12 = vld [vmem:[#allocation5 + $0x8] sm:$0xff]  ;;  %v585_v14 = vld [vmem:[#allocation5] sm:$0xff] }
  0x11   :  { %276 = vmatpush.bf16.msra.mxu0 %v591_v2  ;;  %649 = vmatpush.bf16.msra.mxu2 %v591_v2  ;;  %v594_v13 = vld [vmem:[#allocation5 + $0x48] sm:$0xff]  ;;  %v593_v15 = vld [vmem:[#allocation5 + $0x40] sm:$0xff]  ;;  %v451_v28 = vld [vmem:[#allocation2 + $0x10] sm:$0xf] }
  0x12   :  { %325 = vmatpush.bf16.msra.mxu1 %v599_v3  ;;  %657 = vmatpush.bf16.msra.mxu3 %v599_v3  ;;  %v443_v16 = vld [vmem:[#allocation2] sm:$0xf]  ;;  %v570_v17 = vld [vmem:[#allocation2 + $0x4] sm:$0xf0]  ;;  %v569_v20 = vld [vmem:[#allocation2 + $0x4] sm:$0xf] }
  0x13   :  { %v475_v18 = vld [vmem:[#allocation2 + $0x40] sm:$0xf]  ;;  %v578_v19 = vld [vmem:[#allocation2 + $0x44] sm:$0xf0]  ;;  %v445_v21 = vld [vmem:[#allocation2 + $0x8] sm:$0xf0]  ;;  %v444_v24 = vor.u32 %v570_v17, %v443_v16 }
  0x14   :  { %v577_v22 = vld [vmem:[#allocation2 + $0x44] sm:$0xf]  ;;  %v477_v23 = vld [vmem:[#allocation2 + $0x48] sm:$0xf0]  ;;  %v476_v25 = vor.u32 %v578_v19, %v475_v18  ;;  %v448_v26 = vor.u32 %v569_v20, %v445_v21  ;;  %v572_v29 = vld [vmem:[#allocation2 + $0x14] sm:$0xf0] }
  0x15   :  { %277 = vmatpush.bf16.msra.mxu0 %v590_v4  ;;  %650 = vmatpush.bf16.msra.mxu2 %v590_v4  ;;  %v480_v27 = vor.u32 %v577_v22, %v477_v23  ;;  %v483_v30 = vld [vmem:[#allocation2 + $0x50] sm:$0xf]  ;;  %v580_v31 = vld [vmem:[#allocation2 + $0x54] sm:$0xf0]  ;;  %v571_v32 = vld [vmem:[#allocation2 + $0x14] sm:$0xf]  ;;  %v452_v36 = vor.u32 %v572_v29, %v451_v28 }
  0x16   :  { %326 = vmatpush.bf16.msra.mxu1 %v598_v5  ;;  %658 = vmatpush.bf16.msra.mxu3 %v598_v5  ;;  %v453_v33 = vld [vmem:[#allocation2 + $0x18] sm:$0xf0]  ;;  %v579_v34 = vld [vmem:[#allocation2 + $0x54] sm:$0xf]  ;;  %v484_v37 = vor.u32 %v580_v31, %v483_v30  ;;  %v459_v40 = vld [vmem:[#allocation2 + $0x20] sm:$0xf] }
  0x17   :  { %v485_v35 = vld [vmem:[#allocation2 + $0x58] sm:$0xf0]  ;;  %v456_v38 = vor.u32 %v571_v32, %v453_v33  ;;  %v574_v41 = vld [vmem:[#allocation2 + $0x24] sm:$0xf0]  ;;  %v491_v42 = vld [vmem:[#allocation2 + $0x60] sm:$0xf] }
  0x18   :  { %v488_v39 = vor.u32 %v579_v34, %v485_v35  ;;  %v582_v43 = vld [vmem:[#allocation2 + $0x64] sm:$0xf0]  ;;  %v573_v44 = vld [vmem:[#allocation2 + $0x24] sm:$0xf]  ;;  %v461_v45 = vld [vmem:[#allocation2 + $0x28] sm:$0xf0]  ;;  %v460_v48 = vor.u32 %v574_v41, %v459_v40 }
  0x19   :  { %278 = vmatpush.bf16.msra.mxu0 %v589_v6  ;;  %651 = vmatpush.bf16.msra.mxu2 %v589_v6  ;;  %v581_v46 = vld [vmem:[#allocation2 + $0x64] sm:$0xf]  ;;  %v493_v47 = vld [vmem:[#allocation2 + $0x68] sm:$0xf0]  ;;  %v492_v49 = vor.u32 %v582_v43, %v491_v42  ;;  %v464_v50 = vor.u32 %v573_v44, %v461_v45  ;;  %v467_v52 = vld [vmem:[#allocation2 + $0x30] sm:$0xf] }
  0x1a   :  { %327 = vmatpush.bf16.msra.mxu1 %v597_v7  ;;  %659 = vmatpush.bf16.msra.mxu3 %v597_v7  ;;  %v496_v51 = vor.u32 %v581_v46, %v493_v47  ;;  %v576_v53 = vld [vmem:[#allocation2 + $0x34] sm:$0xf0]  ;;  %v499_v54 = vld [vmem:[#allocation2 + $0x70] sm:$0xf]  ;;  %v575_v56 = vld [vmem:[#allocation2 + $0x34] sm:$0xf] }
  0x1b   :  { %v584_v55 = vld [vmem:[#allocation2 + $0x74] sm:$0xf0]  ;;  %v469_v57 = vld [vmem:[#allocation2 + $0x38] sm:$0xf0]  ;;  %v583_v58 = vld [vmem:[#allocation2 + $0x74] sm:$0xf]  ;;  %v468_v60 = vor.u32 %v576_v53, %v467_v52 }
  0x1c   :  { %v501_v59 = vld [vmem:[#allocation2 + $0x78] sm:$0xf0]  ;;  %v500_v61 = vor.u32 %v584_v55, %v499_v54  ;;  %v472_v62 = vor.u32 %v575_v56, %v469_v57  ;;  %v789_v1 = vld [vmem:[%s815_s2] ss:$0 sm:$0xff]  ;;  %s756_s2 = smov [#allocation7]  }
  0x1d   :  { %279 = vmatpush.bf16.msra.mxu0 %v588_v8  ;;  %652 = vmatpush.bf16.msra.mxu2 %v588_v8  ;;  %v504_v63 = vor.u32 %v583_v58, %v501_v59  ;;  %s425_s26 = sshll.u32 %s756_s2, 4  ;;  %s426_s26 = int_to_ptr.vmem [resolvable:$true] %s425_s26 }
  0x1e   :  { %328 = vmatpush.bf16.msra.mxu1 %v596_v9  ;;  %660 = vmatpush.bf16.msra.mxu3 %v596_v9 }
  0x21   :  { %280 = vmatpush.bf16.msra.mxu0 %v587_v10  ;;  %653 = vmatpush.bf16.msra.mxu2 %v587_v10 }
  0x22   :  { %329 = vmatpush.bf16.msra.mxu1 %v595_v11  ;;  %661 = vmatpush.bf16.msra.mxu3 %v595_v11 }
  0x25   :  { %281 = vmatpush.bf16.msra.mxu0 %v586_v12  ;;  %654 = vmatpush.bf16.msra.mxu2 %v586_v12 }
  0x26   :  { %330 = vmatpush.bf16.msra.mxu1 %v594_v13  ;;  %662 = vmatpush.bf16.msra.mxu3 %v594_v13 }
  0x29   :  { %282 = vmatpush.bf16.msra.mxu0 %v585_v14  ;;  %655 = vmatpush.bf16.msra.mxu2 %v585_v14 }
  0x2a   :  { %331 = vmatpush.bf16.msra.mxu1 %v593_v15  ;;  %663 = vmatpush.bf16.msra.mxu3 %v593_v15 }
  0x2c   :  { %283 = vmatmul.bf16.vlgmr.msra.gmra.mxu0 %v444_v24  ;;  %303 = vmatmul.bf16.vlgmr.msra.gmra.mxu2 %v476_v25 }
  0x2d   :  { %332 = vmatmul.bf16.vlgmr.msra.gmra.mxu1 %v448_v26  ;;  %352 = vmatmul.bf16.vlgmr.msra.gmra.mxu3 %v480_v27 }
  0x3c   :  { %288 = vmatmul.bf16.gmra.mxu0 %v452_v36  ;;  %308 = vmatmul.bf16.gmra.mxu2 %v484_v37 }
  0x3d   :  { %337 = vmatmul.bf16.gmra.mxu1 %v456_v38  ;;  %357 = vmatmul.bf16.gmra.mxu3 %v488_v39 }
  0x4c   :  { %293 = vmatmul.bf16.gmra.mxu0 %v460_v48  ;;  %313 = vmatmul.bf16.gmra.mxu2 %v492_v49 }
  0x4d   :  { %342 = vmatmul.bf16.gmra.mxu1 %v464_v50  ;;  %362 = vmatmul.bf16.gmra.mxu3 %v496_v51 }
  0x5c   :  { %298 = vmatmul.bf16.gmra.mxu0 %v468_v60  ;;  %318 = vmatmul.bf16.gmra.mxu2 %v500_v61 }
  0x5d   :  { %347 = vmatmul.bf16.gmra.mxu1 %v472_v62  ;;  %367 = vmatmul.bf16.gmra.mxu3 %v504_v63 }
  0xa9   :  { %v284_v0 = vpop.f32.mrf.mxu0 }
  0xaa   :  { %v333_v2 = vpop.f32.mrf.mxu1  ;;  %v285_v3 = vadd.f32 %v789_v1, %v284_v0 }
  0xac   :  { %v334_v7 = vadd.f32 %v333_v2, %v285_v3 }
  0xae   :  { %v373_v12 = vmax.f32 %v334_v7, 0.0 }
  0xaf   :  { %v304_v4 = vpop.f32.mrf.mxu2 }
  0xb0   :  { %v353_v5 = vpop.f32.mrf.mxu3  ;;  %v305_v10 = vadd.f32 %v789_v1, %v304_v4 }
  0xb1   :  { %v286_v6 = vpop.f32.mrf.mxu0 }
  0xb2   :  { %v287_v8 = vadd.f32 %v789_v1, %v286_v6  ;;  %v335_v9 = vpop.f32.mrf.mxu1  ;;  %v354_v15 = vadd.f32 %v353_v5, %v305_v10 }
  0xb4   :  { %v336_v11 = vadd.f32 %v335_v9, %v287_v8  ;;  %v381_v22 = vmax.f32 %v354_v15, 0.0 }
  0xb6   :  { %v374_v13 = vmax.f32 %v336_v11, 0.0 }
  0xb7   :  { %v306_v14 = vpop.f32.mrf.mxu2 }
  0xb8   :  { %v604_v16 = vpack.c.bf16 %v374_v13, %v373_v12  ;;  %v307_v17 = vadd.f32 %v789_v1, %v306_v14  ;;  %v355_v18 = vpop.f32.mrf.mxu3 }
  0xb9   :  { %v289_v19 = vpop.f32.mrf.mxu0 }
  0xba   :  { %605 = vst [vmem:[#allocation7] sm:$0xff] %v604_v16   ;;  %v356_v20 = vadd.f32 %v355_v18, %v307_v17  ;;  %v338_v21 = vpop.f32.mrf.mxu1  ;;  %v290_v25 = vadd.f32 %v789_v1, %v289_v19 }
  0xbc   :  { %v382_v23 = vmax.f32 %v356_v20, 0.0  ;;  %v339_v29 = vadd.f32 %v338_v21, %v290_v25 }
  0xbe   :  { %v624_v24 = vpack.c.bf16 %v382_v23, %v381_v22  ;;  %v375_v34 = vmax.f32 %v339_v29, 0.0 }
  0xbf   :  { %v309_v26 = vpop.f32.mrf.mxu2 }
  0xc0   :  { %644 = vst [vmem:[#allocation7 + $0x20] sm:$0xff] %v624_v24   ;;  %v358_v27 = vpop.f32.mrf.mxu3  ;;  %v310_v32 = vadd.f32 %v789_v1, %v309_v26 }
  0xc1   :  { %v291_v28 = vpop.f32.mrf.mxu0 }
  0xc2   :  { %v292_v30 = vadd.f32 %v789_v1, %v291_v28  ;;  %v340_v31 = vpop.f32.mrf.mxu1  ;;  %v359_v37 = vadd.f32 %v358_v27, %v310_v32 }
  0xc4   :  { %v341_v33 = vadd.f32 %v340_v31, %v292_v30  ;;  %v383_v44 = vmax.f32 %v359_v37, 0.0 }
  0xc6   :  { %v376_v35 = vmax.f32 %v341_v33, 0.0 }
  0xc7   :  { %v311_v36 = vpop.f32.mrf.mxu2 }
  0xc8   :  { %v609_v38 = vpack.c.bf16 %v376_v35, %v375_v34  ;;  %v312_v39 = vadd.f32 %v789_v1, %v311_v36  ;;  %v360_v40 = vpop.f32.mrf.mxu3 }
  0xc9   :  { %v294_v41 = vpop.f32.mrf.mxu0 }
  0xca   :  { %641 = vst [vmem:[#allocation7 + $0x8] sm:$0xff] %v609_v38   ;;  %v361_v42 = vadd.f32 %v360_v40, %v312_v39  ;;  %v343_v43 = vpop.f32.mrf.mxu1  ;;  %v295_v47 = vadd.f32 %v789_v1, %v294_v41 }
  0xcc   :  { %v384_v45 = vmax.f32 %v361_v42, 0.0  ;;  %v344_v51 = vadd.f32 %v343_v43, %v295_v47 }
  0xce   :  { %v629_v46 = vpack.c.bf16 %v384_v45, %v383_v44  ;;  %v377_v56 = vmax.f32 %v344_v51, 0.0 }
  0xcf   :  { %v314_v48 = vpop.f32.mrf.mxu2 }
  0xd0   :  { %645 = vst [vmem:[#allocation7 + $0x28] sm:$0xff] %v629_v46   ;;  %v363_v49 = vpop.f32.mrf.mxu3  ;;  %v315_v54 = vadd.f32 %v789_v1, %v314_v48 }
  0xd1   :  { %v296_v50 = vpop.f32.mrf.mxu0 }
  0xd2   :  { %v297_v52 = vadd.f32 %v789_v1, %v296_v50  ;;  %v345_v53 = vpop.f32.mrf.mxu1  ;;  %v364_v59 = vadd.f32 %v363_v49, %v315_v54 }
  0xd4   :  { %v346_v55 = vadd.f32 %v345_v53, %v297_v52  ;;  %v385_v3 = vmax.f32 %v364_v59, 0.0 }
  0xd6   :  { %v378_v57 = vmax.f32 %v346_v55, 0.0 }
  0xd7   :  { %v316_v58 = vpop.f32.mrf.mxu2 }
  0xd8   :  { %v614_v60 = vpack.c.bf16 %v378_v57, %v377_v56  ;;  %v317_v61 = vadd.f32 %v789_v1, %v316_v58  ;;  %v365_v62 = vpop.f32.mrf.mxu3 }
  0xd9   :  { %v299_v63 = vpop.f32.mrf.mxu0 }
  0xda   :  { %642 = vst [vmem:[#allocation7 + $0x10] sm:$0xff] %v614_v60   ;;  %v366_v0 = vadd.f32 %v365_v62, %v317_v61  ;;  %v348_v2 = vpop.f32.mrf.mxu1  ;;  %v300_v6 = vadd.f32 %v789_v1, %v299_v63 }
  0xdc   :  { %v386_v4 = vmax.f32 %v366_v0, 0.0  ;;  %v349_v10 = vadd.f32 %v348_v2, %v300_v6 }
  0xde   :  { %v634_v5 = vpack.c.bf16 %v386_v4, %v385_v3  ;;  %v379_v15 = vmax.f32 %v349_v10, 0.0 }
  0xdf   :  { %v319_v7 = vpop.f32.mrf.mxu2 }
  0xe0   :  { %646 = vst [vmem:[#allocation7 + $0x30] sm:$0xff] %v634_v5   ;;  %v368_v8 = vpop.f32.mrf.mxu3  ;;  %v320_v13 = vadd.f32 %v789_v1, %v319_v7 }
  0xe1   :  { %v301_v9 = vpop.f32.mrf.mxu0 }
  0xe2   :  { %v302_v11 = vadd.f32 %v789_v1, %v301_v9  ;;  %v350_v12 = vpop.f32.mrf.mxu1  ;;  %v369_v18 = vadd.f32 %v368_v8, %v320_v13 }
  0xe4   :  { %v351_v14 = vadd.f32 %v350_v12, %v302_v11  ;;  %v387_v23 = vmax.f32 %v369_v18, 0.0 }
  0xe6   :  { %v380_v16 = vmax.f32 %v351_v14, 0.0 }
  0xe7   :  { %v321_v17 = vpop.f32.mrf.mxu2 }
  0xe8   :  { %v619_v19 = vpack.c.bf16 %v380_v16, %v379_v15  ;;  %v322_v20 = vadd.f32 %v789_v1, %v321_v17  ;;  %v370_v21 = vpop.f32.mrf.mxu3 }
  0xea   :  { %643 = vst [vmem:[#allocation7 + $0x18] sm:$0xff] %v619_v19   ;;  %v371_v22 = vadd.f32 %v370_v21, %v322_v20 }
  0xec   :  { %v388_v24 = vmax.f32 %v371_v22, 0.0 }
  0xee   :  { %v639_v25 = vpack.c.bf16 %v388_v24, %v387_v23 }
  0xf0   :  { %647 = vst [vmem:[#allocation7 + $0x38] sm:$0xff] %v639_v25  }
  0xf1   :  { %433 = dma.vmem_to_hbm [thread:$0]  %s426_s26, 1024, %s428_s29, [#allocation4], %s754_s24, %s754_s24, %s755_s25  }
  0xf2   :  { %748 = dma.done.wait [#allocation4], 1024  }
  0xf3   :  { %749 = vsyncadd [#allocation4], 4294966272 }
  0xf4   :  { %438 = vsyncpa [#allocation3], 1 }
  0xf5   :  { %439 = vsyncpa [#allocation6], 1 }
  0xf6   :  { %440 = vsyncpa [#allocation4], 1 }

</bundles_post_ra>
